<compile_context>
chip_gen: v7x
topology: tpu7x:2x2x1
jax: 0.10.0
libtpu: 0.0.40
codegen_flags: <defaults>
</compile_context>

<pallas_src>
import functools

import numpy as np
import jax
import jax.numpy as jnp
from jax.experimental import pallas as pl
from jax.experimental.pallas import tpu as pltpu

ACT_DTYPE = jnp.bfloat16
_VMEM_LIMIT = 32 * 1024 * 1024

# torchvision efficientnet_v2_m stage config:
# (block kind, expand ratio, out channels, repeats, first-block stride)
EFFNET_V2_M_CFG = [
    ("fused", 1, 24, 3, 1),
    ("fused", 4, 48, 5, 2),
    ("fused", 4, 80, 5, 2),
    ("mbconv", 4, 160, 7, 2),
    ("mbconv", 6, 176, 14, 1),
    ("mbconv", 6, 304, 18, 2),
    ("mbconv", 6, 512, 5, 1),
]
STEM_CH = 24
FEAT_DIM = 1280  # TODO(synk): the PyTorch spec hard-codes feat_dim=1028, but torchvision
                 # efficientnet_v2_m's post-pool feature width is 1280 (1028 would not run).


# ---------------------------------------------------------------------------
# Kernel 1: (B, M, K) @ (K, N) + folded BN + optional SiLU / residual / pool
# ---------------------------------------------------------------------------
@functools.partial(jax.jit, static_argnames=("act", "pool", "out_dtype"))
def matmul_bn_act(x, w, scale, bias, residual=None, *, act=True, pool=False,
                  out_dtype=ACT_DTYPE):
    """y = [silu](x @ w * scale + bias) [+ residual]; mean over rows if pool.

    x: (B, M, K) bf16; w: (K, N) bf16; scale/bias: (1, N) f32;
    residual: optional (B, M, N) bf16.
    """
    B, M, K = x.shape
    N = w.shape[-1]
    has_res = residual is not None
    mt = M if (pool or M <= 128) else 128          # row tile -> small f32 acc
    grid = (B, M // mt)

    def kernel(*refs):
        if has_res:
            x_ref, w_ref, s_ref, b_ref, r_ref, o_ref = refs
        else:
            x_ref, w_ref, s_ref, b_ref, o_ref = refs
        y = jnp.dot(x_ref[0], w_ref[...], preferred_element_type=jnp.float32)
        y = y * s_ref[...] + b_ref[...]            # folded BN, f32 epilogue
        if act:
            y = y * jax.nn.sigmoid(y)              # SiLU
        if has_res:
            y = y + r_ref[0].astype(jnp.float32)
        if pool:
            y = jnp.mean(y, axis=0, keepdims=True)
        o_ref[...] = y[None].astype(o_ref.dtype)

    in_specs = [pl.BlockSpec((1, mt, K), lambda b, t: (b, t, 0)),
                pl.BlockSpec((K, N), lambda b, t: (0, 0)),
                pl.BlockSpec((1, N), lambda b, t: (0, 0)),
                pl.BlockSpec((1, N), lambda b, t: (0, 0))]
    args = [x, w, scale, bias]
    if has_res:
        in_specs.append(pl.BlockSpec((1, mt, N), lambda b, t: (b, t, 0)))
        args.append(residual)
    Mo, mo = (1, 1) if pool else (M, mt)

    return pl.pallas_call(
        kernel,
        out_shape=jax.ShapeDtypeStruct((B, Mo, N), out_dtype),
        grid_spec=pltpu.PrefetchScalarGridSpec(
            num_scalar_prefetch=0, grid=grid,
            in_specs=in_specs,
            out_specs=pl.BlockSpec((1, mo, N), lambda b, t: (b, t, 0))),
        compiler_params=pltpu.CompilerParams(
            dimension_semantics=("parallel", "parallel"),
            vmem_limit_bytes=_VMEM_LIMIT),
    )(*args)


# ---------------------------------------------------------------------------
# Kernel 2: 3x3 conv (pad=1) + folded BN + SiLU (+ optional residual)
# ---------------------------------------------------------------------------
@functools.partial(jax.jit, static_argnames=("stride",))
def conv3x3_bn_silu(x, w, scale, bias, residual=None, *, stride=1):
    """x: (B, H, W, Cin) bf16; w: (3, 3, Cin, Cout) bf16; scale/bias: (1, Cout) f32."""
    B, H, W, Cin = x.shape
    Cout = w.shape[-1]
    xp = jnp.pad(x, ((0, 0), (1, 1), (1, 1), (0, 0)))       # conv padding = 1

    if stride == 2:
        # im2col in the wrapper (pure layout plumbing), one big matmul in Pallas.
        Ho, Wo = H // 2, W // 2
        taps = [xp[:, dy:dy + 2 * (Ho - 1) + 1:2, dx:dx + 2 * (Wo - 1) + 1:2, :]
                for dy in range(3) for dx in range(3)]
        xim = jnp.concatenate(taps, axis=-1).reshape(B, Ho * Wo, 9 * Cin)
        wim = w.reshape(9 * Cin, Cout)
        K = 9 * Cin
        Kp = ((K + 7) // 8) * 8                              # stem: 27 -> 32
        if Kp != K:
            xim = jnp.pad(xim, ((0, 0), (0, 0), (0, Kp - K)))
            wim = jnp.pad(wim, ((0, Kp - K), (0, 0)))
        out = matmul_bn_act(xim, wim, scale, bias, act=True)
        return out.reshape(B, Ho, Wo, Cout)

    # ---- stride 1: dx folded into the contraction, rows tiled over the grid ----
    w3 = w.reshape(3, 3 * Cin, Cout)
    TR = H
    while TR > 2 and TR * W * Cout * 4 > 64 * 1024:          # keep f32 acc small
        TR //= 2
    grid = (B, H // TR)
    has_res = residual is not None

    def kernel(*refs):
        if has_res:
            x_ref, w_ref, s_ref, b_ref, r_ref, o_ref = refs
        else:
            x_ref, w_ref, s_ref, b_ref, o_ref = refs
        row0 = pl.program_id(1) * TR
        acc = None
        for dy in range(3):
            rows = x_ref[0, pl.ds(row0 + dy, TR)]            # (TR, W+2, Cin)
            patch = jnp.concatenate([rows[:, dx:dx + W, :] for dx in range(3)],
                                    axis=-1)                 # (TR, W, 3*Cin)
            d = jnp.dot(patch.reshape(TR * W, 3 * Cin), w_ref[dy],
                        preferred_element_type=jnp.float32)
            acc = d if acc is None else acc + d              # in-register acc
        y = acc * s_ref[...] + b_ref[...]
        y = y * jax.nn.sigmoid(y)                            # SiLU
        if has_res:
            y = y + r_ref[0].reshape(TR * W, Cout).astype(jnp.float32)
        o_ref[...] = y.reshape(1, TR, W, Cout).astype(o_ref.dtype)

    in_specs = [pl.BlockSpec((1, H + 2, W + 2, Cin), lambda b, t: (b, 0, 0, 0)),
                pl.BlockSpec((3, 3 * Cin, Cout), lambda b, t: (0, 0, 0)),
                pl.BlockSpec((1, Cout), lambda b, t: (0, 0)),
                pl.BlockSpec((1, Cout), lambda b, t: (0, 0))]
    args = [xp, w3, scale, bias]
    if has_res:
        in_specs.append(pl.BlockSpec((1, TR, W, Cout), lambda b, t: (b, t, 0, 0)))
        args.append(residual)

    return pl.pallas_call(
        kernel,
        out_shape=jax.ShapeDtypeStruct((B, H, W, Cout), ACT_DTYPE),
        grid_spec=pltpu.PrefetchScalarGridSpec(
            num_scalar_prefetch=0, grid=grid,
            in_specs=in_specs,
            out_specs=pl.BlockSpec((1, TR, W, Cout), lambda b, t: (b, t, 0, 0))),
        compiler_params=pltpu.CompilerParams(
            dimension_semantics=("parallel", "parallel"),
            vmem_limit_bytes=_VMEM_LIMIT),
    )(*args)


# ---------------------------------------------------------------------------
# Kernel 3: fused depthwise 3x3 + folded BN + SiLU + squeeze-excite gating
# ---------------------------------------------------------------------------
@functools.partial(jax.jit, static_argnames=("stride",))
def depthwise_se_bn_silu(x, wd, scale, bias, w1, b1, w2, b2, *, stride=1):
    """x: (B, H, W, C) bf16; wd: (9, 1, C) f32; scale/bias: (1, C) f32;
    SE: w1 (C, Cse) bf16, b1 (1, Cse) f32, w2 (Cse, C) bf16, b2 (1, C) f32."""
    B, H, W, C = x.shape
    Ho, Wo = H // stride, W // stride
    N = Ho * Wo
    Cse = w1.shape[-1]
    xp = jnp.pad(x, ((0, 0), (1, 1), (1, 1), (0, 0)))
    taps = jnp.stack(
        [xp[:, dy:dy + stride * (Ho - 1) + 1:stride,
             dx:dx + stride * (Wo - 1) + 1:stride, :]
         for dy in range(3) for dx in range(3)], axis=1)      # (B, 9, Ho, Wo, C)
    taps = taps.reshape(B, 9, N, C)

    def kernel(x_ref, wd_ref, s_ref, b_ref, w1_ref, b1_ref, w2_ref, b2_ref, o_ref):
        acc = None
        for k in range(9):                                    # depthwise taps (VPU)
            d = x_ref[0, k].astype(jnp.float32) * wd_ref[k]
            acc = d if acc is None else acc + d
        y = acc * s_ref[...] + b_ref[...]
        y = y * jax.nn.sigmoid(y)                             # SiLU, (N, C) f32
        # squeeze-excite (global mean + two tiny FCs + sigmoid gate), fused
        sq = jnp.mean(y, axis=0, keepdims=True)               # (1, C)
        h = jnp.dot(sq.astype(jnp.bfloat16), w1_ref[...],
                    preferred_element_type=jnp.float32) + b1_ref[...]
        h = h * jax.nn.sigmoid(h)
        g = jnp.dot(h.astype(jnp.bfloat16), w2_ref[...],
                    preferred_element_type=jnp.float32) + b2_ref[...]
        g = jax.nn.sigmoid(g)                                 # (1, C)
        o_ref[...] = (y * g)[None].astype(o_ref.dtype)

    out = pl.pallas_call(
        kernel,
        out_shape=jax.ShapeDtypeStruct((B, N, C), ACT_DTYPE),
        grid_spec=pltpu.PrefetchScalarGridSpec(
            num_scalar_prefetch=0, grid=(B,),
            in_specs=[pl.BlockSpec((1, 9, N, C), lambda b: (b, 0, 0, 0)),
                      pl.BlockSpec((9, 1, C), lambda b: (0, 0, 0)),
                      pl.BlockSpec((1, C), lambda b: (0, 0)),
                      pl.BlockSpec((1, C), lambda b: (0, 0)),
                      pl.BlockSpec((C, Cse), lambda b: (0, 0)),
                      pl.BlockSpec((1, Cse), lambda b: (0, 0)),
                      pl.BlockSpec((Cse, C), lambda b: (0, 0)),
                      pl.BlockSpec((1, C), lambda b: (0, 0))],
            out_specs=pl.BlockSpec((1, N, C), lambda b: (b, 0, 0))),
        compiler_params=pltpu.CompilerParams(
            dimension_semantics=("parallel",),
            vmem_limit_bytes=_VMEM_LIMIT),
    )(taps, wd, scale, bias, w1, b1, w2, b2)
    return out.reshape(B, Ho, Wo, C)


# ---------------------------------------------------------------------------
# Synthetic, deterministic parameters (BN folded in inference form)
# ---------------------------------------------------------------------------
def _fold_bn(rng, c):
    gamma = 1.0 + 0.1 * rng.standard_normal(c)
    beta = 0.1 * rng.standard_normal(c)
    mean = 0.1 * rng.standard_normal(c)
    var = rng.uniform(0.5, 1.5, c)
    scale = gamma / np.sqrt(var + 1e-3)
    bias = beta - mean * scale
    return (jnp.asarray(scale.reshape(1, c), jnp.float32),
            jnp.asarray(bias.reshape(1, c), jnp.float32))


def _conv_w(rng, shape, fan_in, dtype=jnp.bfloat16):
    return jnp.asarray(rng.standard_normal(shape) * np.sqrt(2.0 / fan_in), dtype)


def init_params(n_classes=10, seed=0):
    # TODO(synk): the PyTorch module loads torchvision pretrained weights; no
    # checkpoint access here, so all parameters are synthetic (deterministic).
    rng = np.random.default_rng(seed)
    params = {"stem": {"w": _conv_w(rng, (3, 3, 3, STEM_CH), 27),
                       "bn": _fold_bn(rng, STEM_CH)}}
    cin = STEM_CH
    stages = []
    for kind, expand, cout, repeats, stride in EFFNET_V2_M_CFG:
        blocks = []
        for r in range(repeats):
            s = stride if r == 0 else 1
            blk = {"stride": s, "use_res": (s == 1 and cin == cout)}
            if kind == "fused" and expand == 1:
                blk["kind"] = "fused1"
                blk["w"] = _conv_w(rng, (3, 3, cin, cout), 9 * cin)
                blk["bn"] = _fold_bn(rng, cout)
            elif kind == "fused":
                ce = cin * expand
                blk["kind"] = "fused"
                blk["w_exp"] = _conv_w(rng, (3, 3, cin, ce), 9 * cin)
                blk["bn1"] = _fold_bn(rng, ce)
                blk["w_proj"] = _conv_w(rng, (ce, cout), ce)
                blk["bn2"] = _fold_bn(rng, cout)
            else:  # mbconv
                ce = cin * expand
                cse = max(1, cin // 4)
                blk["kind"] = "mbconv"
                blk["w_exp"] = _conv_w(rng, (cin, ce), cin)
                blk["bn1"] = _fold_bn(rng, ce)
                blk["w_dw"] = _conv_w(rng, (3, 3, ce), 9, jnp.float32).reshape(9, 1, ce)
                blk["bn2"] = _fold_bn(rng, ce)
                blk["se_w1"] = _conv_w(rng, (ce, cse), ce)
                blk["se_b1"] = jnp.asarray(0.01 * rng.standard_normal((1, cse)), jnp.float32)
                blk["se_w2"] = _conv_w(rng, (cse, ce), cse)
                blk["se_b2"] = jnp.asarray(0.01 * rng.standard_normal((1, ce)), jnp.float32)
                blk["w_proj"] = _conv_w(rng, (ce, cout), ce)
                blk["bn3"] = _fold_bn(rng, cout)
            blocks.append(blk)
            cin = cout
        stages.append(blocks)
    params["stages"] = stages
    params["head"] = {"w": _conv_w(rng, (cin, FEAT_DIM), cin),
                      "bn": _fold_bn(rng, FEAT_DIM)}
    params["fc"] = {"w": _conv_w(rng, (FEAT_DIM, n_classes), FEAT_DIM),
                    "scale": jnp.ones((1, n_classes), jnp.float32),
                    "bias": jnp.asarray(0.01 * rng.standard_normal((1, n_classes)),
                                        jnp.float32)}
    return params


# ---------------------------------------------------------------------------
# Forward pass (eval mode: stochastic depth / dropout are identity)
# ---------------------------------------------------------------------------
def apply_block(blk, x):
    kind = blk["kind"]
    stride = blk["stride"]
    res = x if blk["use_res"] else None

    if kind == "fused1":            # FusedMBConv, expand ratio 1
        return conv3x3_bn_silu(x, blk["w"], *blk["bn"], residual=res, stride=stride)

    if kind == "fused":             # FusedMBConv, expand > 1
        h = conv3x3_bn_silu(x, blk["w_exp"], *blk["bn1"], stride=stride)
        B, H, W, Ce = h.shape
        r2 = None if res is None else res.reshape(B, H * W, -1)
        out = matmul_bn_act(h.reshape(B, H * W, Ce), blk["w_proj"], *blk["bn2"],
                            residual=r2, act=False)
        return out.reshape(B, H, W, -1)

    # MBConv: expand 1x1 -> depthwise+SE (fused) -> project 1x1 (+residual)
    B, H, W, Cin = x.shape
    h = matmul_bn_act(x.reshape(B, H * W, Cin), blk["w_exp"], *blk["bn1"], act=True)
    Ce = h.shape[-1]
    h = depthwise_se_bn_silu(h.reshape(B, H, W, Ce), blk["w_dw"], *blk["bn2"],
                             blk["se_w1"], blk["se_b1"], blk["se_w2"], blk["se_b2"],
                             stride=stride)
    B, Ho, Wo, _ = h.shape
    r2 = None if res is None else res.reshape(B, Ho * Wo, -1)
    out = matmul_bn_act(h.reshape(B, Ho * Wo, Ce), blk["w_proj"], *blk["bn3"],
                        residual=r2, act=False)
    return out.reshape(B, Ho, Wo, -1)


def effnet_v2_m_forward(params, x_nchw):
    """Mirrors EfficientNet_v2_m2.forward: returns (feature, res)."""
    x = jnp.transpose(x_nchw, (0, 2, 3, 1)).astype(ACT_DTYPE)      # NCHW -> NHWC
    x = conv3x3_bn_silu(x, params["stem"]["w"], *params["stem"]["bn"], stride=2)
    for stage in params["stages"]:
        for blk in stage:
            x = apply_block(blk, x)
    B, H, W, C = x.shape
    # head 1x1 conv + BN + SiLU with the global average pool fused in its epilogue
    feature = matmul_bn_act(x.reshape(B, H * W, C), params["head"]["w"],
                            *params["head"]["bn"], act=True, pool=True,
                            out_dtype=jnp.float32)
    feature = feature.reshape(B, FEAT_DIM)
    logits = matmul_bn_act(feature.astype(ACT_DTYPE)[None], params["fc"]["w"],
                           params["fc"]["scale"], params["fc"]["bias"],
                           act=False, out_dtype=jnp.float32)
    return feature, logits.reshape(B, -1)


if __name__ == "__main__":
    n_classes = 10
    params = init_params(n_classes=n_classes, seed=0)

    # Small input: 64x64 RGB, batch 2 (the 32x total downsampling of
    # EfficientNetV2-M leaves a 2x2 map before the head / global pool).
    x = jax.random.normal(jax.random.PRNGKey(0), (2, 3, 64, 64), jnp.float32)

    feature, out = effnet_v2_m_forward(params, x)
    jax.block_until_ready((feature, out))

    assert feature.shape == (2, FEAT_DIM), feature.shape
    assert out.shape == (2, n_classes), out.shape
    assert bool(jnp.all(jnp.isfinite(feature))) and bool(jnp.all(jnp.isfinite(out)))
    print("KERNEL_OK")
</pallas_src>

<mosaic_0001>
module attributes {stable_mosaic.version = 11 : i64} {
  func.func @kernel(%arg0: i32, %arg1: i32, %arg2: memref<1x128x32xbf16, #tpu.memory_space<vmem>>, %arg3: memref<32x24xbf16, #tpu.memory_space<vmem>>, %arg4: memref<1x24xf32, #tpu.memory_space<vmem>>, %arg5: memref<1x24xf32, #tpu.memory_space<vmem>>, %arg6: memref<1x128x24xbf16, #tpu.memory_space<vmem>>) attributes {dimension_semantics = [#tpu.dimension_semantics<parallel>, #tpu.dimension_semantics<parallel>], iteration_bounds = array<i64: 2, 8>, scalar_prefetch = 0 : i64, scratch_operands = 0 : i64, tpu.core_type = #tpu.core_type<tc>, window_params = [{transform_indices = @transform_0, window_bounds = array<i64: 1, 128, 32>}, {pipeline_mode = #tpu.pipeline_mode<synchronous>, transform_indices = @transform_1, window_bounds = array<i64: 32, 24>}, {pipeline_mode = #tpu.pipeline_mode<synchronous>, transform_indices = @transform_2, window_bounds = array<i64: 1, 24>}, {pipeline_mode = #tpu.pipeline_mode<synchronous>, transform_indices = @transform_3, window_bounds = array<i64: 1, 24>}, {transform_indices = @transform_4, window_bounds = array<i64: 1, 128, 24>}]} {
    %c0 = arith.constant 0 : index
    %c0_0 = arith.constant 0 : index
    %c0_1 = arith.constant 0 : index
    %0 = vector.load %arg2[%c0, %c0_0, %c0_1] : memref<1x128x32xbf16, #tpu.memory_space<vmem>>, vector<1x128x32xbf16>
    %1 = vector.shape_cast %0 : vector<1x128x32xbf16> to vector<128x32xbf16>
    %c0_2 = arith.constant 0 : index
    %c0_3 = arith.constant 0 : index
    %2 = vector.load %arg3[%c0_2, %c0_3] : memref<32x24xbf16, #tpu.memory_space<vmem>>, vector<32x24xbf16>
    %cst = arith.constant dense<0.000000e+00> : vector<128x24xf32>
    %3 = tpu.matmul %1, %2, %cst {dimension_numbers = #tpu.dot_dimension_numbers<[1], [0], [0], [1], [0, 0, 1, 1], [], []>} : vector<128x32xbf16>, vector<32x24xbf16>, vector<128x24xf32> -> vector<128x24xf32>
    %c0_4 = arith.constant 0 : index
    %c0_5 = arith.constant 0 : index
    %4 = vector.load %arg4[%c0_4, %c0_5] : memref<1x24xf32, #tpu.memory_space<vmem>>, vector<1x24xf32>
    %5 = vector.broadcast %4 : vector<1x24xf32> to vector<128x24xf32>
    %6 = arith.mulf %3, %5 : vector<128x24xf32>
    %c0_6 = arith.constant 0 : index
    %c0_7 = arith.constant 0 : index
    %7 = vector.load %arg5[%c0_6, %c0_7] : memref<1x24xf32, #tpu.memory_space<vmem>>, vector<1x24xf32>
    %8 = vector.broadcast %7 : vector<1x24xf32> to vector<128x24xf32>
    %9 = arith.addf %6, %8 : vector<128x24xf32>
    %10 = arith.negf %9 : vector<128x24xf32>
    %11 = math.exp %10 : vector<128x24xf32>
    %cst_8 = arith.constant 1.000000e+00 : f32
    %12 = vector.broadcast %cst_8 : f32 to vector<128x24xf32>
    %13 = arith.addf %12, %11 : vector<128x24xf32>
    %14 = arith.divf %12, %13 : vector<128x24xf32>
    %15 = arith.mulf %9, %14 : vector<128x24xf32>
    %16 = vector.shape_cast %15 : vector<128x24xf32> to vector<1x128x24xf32>
    %17 = arith.truncf %16 : vector<1x128x24xf32> to vector<1x128x24xbf16>
    %c0_9 = arith.constant 0 : index
    %c0_10 = arith.constant 0 : index
    %c0_11 = arith.constant 0 : index
    %18 = vector.load %arg6[%c0_9, %c0_10, %c0_11] : memref<1x128x24xbf16, #tpu.memory_space<vmem>>, vector<1x128x24xbf16>
    tpu.vector_store %arg6[%c0_9, %c0_10, %c0_11], %17 {strides = array<i32>} : memref<1x128x24xbf16, #tpu.memory_space<vmem>>, vector<1x128x24xbf16>,
    return
  }
  func.func @transform_0(%arg0: i32, %arg1: i32) -> (i32, i32, i32) {
    %c0_i32 = arith.constant 0 : i32
    %c0_i32_0 = arith.constant 0 : i32
    return %arg0, %arg1, %c0_i32 : i32, i32, i32
  }
  func.func @transform_1(%arg0: i32, %arg1: i32) -> (i32, i32) {
    %c0_i32 = arith.constant 0 : i32
    %c0_i32_0 = arith.constant 0 : i32
    %c0_i32_1 = arith.constant 0 : i32
    return %c0_i32, %c0_i32_0 : i32, i32
  }
  func.func @transform_2(%arg0: i32, %arg1: i32) -> (i32, i32) {
    %c0_i32 = arith.constant 0 : i32
    %c0_i32_0 = arith.constant 0 : i32
    %c0_i32_1 = arith.constant 0 : i32
    return %c0_i32, %c0_i32_0 : i32, i32
  }
  func.func @transform_3(%arg0: i32, %arg1: i32) -> (i32, i32) {
    %c0_i32 = arith.constant 0 : i32
    %c0_i32_0 = arith.constant 0 : i32
    %c0_i32_1 = arith.constant 0 : i32
    return %c0_i32, %c0_i32_0 : i32, i32
  }
  func.func @transform_4(%arg0: i32, %arg1: i32) -> (i32, i32, i32) {
    %c0_i32 = arith.constant 0 : i32
    %c0_i32_0 = arith.constant 0 : i32
    return %arg0, %arg1, %c0_i32 : i32, i32, i32
  }
}

</mosaic_0001>

<bundles_post_ra>
// kernel: matmul_bn_act.1
= control target key start
LH: loop header
LB: loop body
LE: loop exit
PB: predicated region body
PF: predicated region fallthrough
CT: control target
= control target key end

     0   :  { %s1055_s15 = smov 0   ;;  %s1057_s16 = smov 0   ;;  %s1267_s0 = inlined_call_operand.vmem [shape: bf16[2,1024,32], index: 0, kind: input, shape index: {}]   ;;  %s1268_s1 = inlined_call_operand.vmem [shape: bf16[32,24], index: 1, kind: input, shape index: {}]   ;;  %s1269_s2 = inlined_call_operand.vmem [shape: f32[1,24], index: 2, kind: input, shape index: {}]   ;;  %s1270_s3 = inlined_call_operand.vmem [shape: f32[1,24], index: 3, kind: input, shape index: {}]   ;;  %s1271_s4 = inlined_call_operand.vmem [shape: bf16[2,1024,24], index: 4, kind: output, shape index: {}]  }
   0x1   :  { %s1059_s17 = smov 0   ;;  %s1061_s18 = smov 0  }
   0x2   :  { %s1063_s19 = smov 0  }
   0x3 LB: > { %s23_s20 = sadd.s32 1, %s1020_s17  ;;  %s26_s21 = sadd.s32 1, %s1024_s18  ;;  %s1028_s19 = sphi %s1063_s19, %s14_s19   ;;  %s1024_s18 = sphi %s1061_s18, %s1275_s18   ;;  %s1020_s17 = sphi %s1059_s17, %s1274_s17   ;;  %s1016_s16 = sphi %s1057_s16, %s1273_s16   ;;  %s1012_s15 = sphi %s1055_s15, %s1272_s15  }
   0x4   : > { %p24_p0 = scmp.ge.s32.totalorder %s23_s20, 8  ;;  %p765_p1 = scmp.ge.s32.totalorder %s1028_s19, 1 }
   0x5   : > { %p183_p2 = scmp.lt.s32.totalorder %s1028_s19, 17 }
   0x6   : > { %s1277_s20 = smov (%p24_p0, %s23_s20), 0  ;;  %s1279_s21 = smov (!%p24_p0, %s26_s21), %s1024_s18 }
   0x7   : > { %p184_p3 = pnand %p765_p1, %p183_p2  ;;  %p28_p4 = scmp.ge.s32.totalorder %s1279_s21, 2 }
   0x8   : > { %v916_v0 = vld [vmem:[%s1268_s1] sm:$0xff] (!%p184_p3)   ;;  %s766_s24 = sshll.u32 (!%p184_p3), %s1012_s15, 4  ;;  %v917_v1 = vld [vmem:[%s1268_s1 + $0x8] sm:$0xff] (!%p184_p3)   ;;  %p218_p5 = scmp.lt.s32.totalorder (!%p184_p3), %s1016_s16, 1  ;;  %vm310_vm0 = vcmask (!%p184_p3), 261120   ;;  %vm654_vm1 = vcmask (!%p184_p3), 191488  }
   0x9   : > { %s1281_s21 = smov (%p28_p4, %s1279_s21), 0  ;;  %187 = sbr.rel (%p184_p3) target bundleno = 298 (0x12a), region = 36 }
   0xa   : > { %852 = vmatprep.subr.bf16.mxu0 (!%p184_p3), %v916_v0  ;;  %872 = vmatprep.subr.bf16.mxu1 (!%p184_p3), %v916_v0  ;;  %p220_p6 = scmp.lt.s32.totalorder (!%p184_p3), %s766_s24, 127  ;;  %v1110_v10 = vld [vmem:[%s1269_s2] ss:$0 sm:$0xff] (!%p184_p3) }
   0xb   : > { %853 = vmatpush3.bf16.msra.mxu0 (!%p184_p3), %v916_v0  ;;  %874 = vmatpush3.bf16.msra.mxu1 (!%p184_p3), %v916_v0  ;;  %v1115_v12 = vld [vmem:[%s1270_s3] ss:$0 sm:$0xff] (!%p184_p3) }
   0xc   : > { %854 = vmatprep.subr.bf16.mxu0 (!%p184_p3), %v917_v1  ;;  %873 = vmatprep.subr.bf16.mxu1 (!%p184_p3), %v917_v1 }
   0xf   : > { %855 = vmatpush3.bf16.msra.mxu0 (!%p184_p3), %v917_v1  ;;  %875 = vmatpush3.bf16.msra.mxu1 (!%p184_p3), %v917_v1 }
  0x10   : > { %s1283_s16 = smov (!%p218_p5, %s1016_s16), 1  ;;  %s1285_s24 = smov (!%p220_p6, %s766_s24), 127 }
  0x11   : > { %s767_s27 = sshll.u32 %s1283_s16, 7 }
  0x12   : > { %s1091_s28 = sadd.s32 %s767_s27, %s1285_s24 }
  0x13   : > { %s768_s29 = sshll.u32 %s1091_s28, 2 }
  0x14   : > { %s225_s6 = scalar_lea.vmem %s1267_s0, %s768_s29  ;;  %s1203_s13 = scalar_lea.vmem %s1271_s4, %s768_s29 }
  0x15   : > { %v918_v2 = vld [vmem:[%s225_s6] sm:$0xff]   ;;  %v920_v4 = vld [vmem:[%s225_s6 + $0x8] sm:$0xff]   ;;  %v922_v6 = vld [vmem:[%s225_s6 + $0x10] sm:$0xff]  }
  0x16   : > { %v919_v3 = vld [vmem:[%s225_s6 + $0x20] sm:$0xff]   ;;  %856 = vmatprep.mubr.msk.bf16.mxu0 %vm310_vm0, %v918_v2  ;;  %v921_v5 = vld [vmem:[%s225_s6 + $0x28] sm:$0xff]   ;;  %v923_v7 = vld [vmem:[%s225_s6 + $0x30] sm:$0xff]  }
  0x17   : > { %864 = vmatprep.mubr.msk.bf16.mxu1 %vm310_vm0, %v919_v3  ;;  %857 = vmatmul.mubr.msk.bf16.vlgmr.msra.gmra.mrb[0].mxu0 %vm310_vm0, %v920_v4  ;;  %v924_v8 = vld [vmem:[%s225_s6 + $0x18] sm:$0xff]  }
  0x18   : > { %865 = vmatmul.mubr.msk.bf16.vlgmr.msra.gmra.mrb[0].mxu1 %vm310_vm0, %v921_v5  ;;  %860 = vmatprep.mubr.msk.bf16.mxu0 %vm310_vm0, %v922_v6  ;;  %v925_v9 = vld [vmem:[%s225_s6 + $0x38] sm:$0xff]  }
  0x19   : > { %868 = vmatprep.mubr.msk.bf16.mxu1 %vm310_vm0, %v923_v7 }
  0x1f   : > { %861 = vmatmul.mubr.msk.bf16.gmra.mrb[4].mxu0 %vm310_vm0, %v924_v8 }
  0x20   : > { %869 = vmatmul.mubr.msk.bf16.gmra.mrb[4].mxu1 %vm310_vm0, %v925_v9 }
  0xea   : > { %v858_v11 = vpop.f32.mrb[0].mxu0 }
  0xeb   : > { %v441_v13 = vmul.f32 %v858_v11, %v1110_v10  ;;  %v866_v14 = vpop.f32.mrb[0].mxu1  ;;  %v369_v15 = vpop.f32.mrb[1].mxu0 }
  0xec   : > { %v449_v16 = vmul.f32 %v866_v14, %v1110_v10  ;;  %v439_v17 = vmul.f32 %v1110_v10, %v369_v15  ;;  %v401_v18 = vpop.f32.mrb[1].mxu1  ;;  %v859_v19 = vpop.f32.mrb[2].mxu0 }
  0xed   : > { %v1121_v20 = vadd.f32 %v1115_v12, %v441_v13  ;;  %v447_v21 = vmul.f32 %v1110_v10, %v401_v18  ;;  %v442_v22 = vmul.f32 %v859_v19, %v1110_v10  ;;  %v867_v23 = vpop.f32.mrb[2].mxu1  ;;  %v372_v24 = vpop.f32.mrb[3].mxu0 }
  0xee   : > { %v1126_v25 = vadd.f32 %v1115_v12, %v449_v16  ;;  %v1129_v26 = vadd.f32 %v1115_v12, %v439_v17  ;;  %v450_v27 = vmul.f32 %v867_v23, %v1110_v10  ;;  %v440_v28 = vmul.f32 %v1110_v10, %v372_v24  ;;  %v404_v29 = vpop.f32.mrb[3].mxu1 }
  0xef   : > { %v794_v30 = vmul.f32 -1.442695, %v1121_v20  ;;  %v1135_v31 = vadd.f32 %v1115_v12, %v447_v21  ;;  %v1138_v32 = vadd.f32 %v1115_v12, %v442_v22  ;;  %v448_v33 = vmul.f32 %v1110_v10, %v404_v29 }
  0xf0   : > { %v802_v34 = vmul.f32 -1.442695, %v1126_v25  ;;  %v792_v35 = vmul.f32 -1.442695, %v1129_v26  ;;  %v1144_v36 = vadd.f32 %v1115_v12, %v450_v27  ;;  %v1147_v37 = vadd.f32 %v1115_v12, %v440_v28 }
  0xf1   : > { %926 = vpow2.f32 %v794_v30  ;;  %v800_v38 = vmul.f32 -1.442695, %v1135_v31  ;;  %v795_v39 = vmul.f32 -1.442695, %v1138_v32  ;;  %v1152_v40 = vadd.f32 %v1115_v12, %v448_v33 }
  0xf2   : > { %928 = vpow2.f32 %v802_v34  ;;  %v803_v41 = vmul.f32 -1.442695, %v1144_v36  ;;  %v862_v42 = vpop.f32.mrb[4].mxu0  ;;  %v793_v43 = vmul.f32 -1.442695, %v1147_v37 }
  0xf3   : > { %930 = vpow2.f32 %v792_v35  ;;  %v445_v44 = vmul.f32 %v862_v42, %v1110_v10  ;;  %v870_v45 = vpop.f32.mrb[4].mxu1  ;;  %v385_v46 = vpop.f32.mrb[5].mxu0  ;;  %v801_v47 = vmul.f32 -1.442695, %v1152_v40 }
  0xf4   : > { %932 = vpow2.f32 %v800_v38  ;;  %v453_v48 = vmul.f32 %v870_v45, %v1110_v10  ;;  %v443_v49 = vmul.f32 %v1110_v10, %v385_v46  ;;  %v417_v50 = vpop.f32.mrb[5].mxu1  ;;  %v863_v51 = vpop.f32.mrb[6].mxu0 }
  0xf5   : > { %934 = vpow2.f32 %v795_v39  ;;  %v1161_v52 = vadd.f32 %v1115_v12, %v445_v44  ;;  %v451_v53 = vmul.f32 %v1110_v10, %v417_v50  ;;  %v446_v54 = vmul.f32 %v863_v51, %v1110_v10  ;;  %v871_v55 = vpop.f32.mrb[6].mxu1  ;;  %v388_v56 = vpop.f32.mrb[7].mxu0 }
  0xf6   : > { %936 = vpow2.f32 %v803_v41  ;;  %v1166_v57 = vadd.f32 %v1115_v12, %v453_v48  ;;  %v1169_v58 = vadd.f32 %v1115_v12, %v443_v49  ;;  %v420_v59 = vpop.f32.mrb[7].mxu1  ;;  %v454_v14 = vmul.f32 %v871_v55, %v1110_v10 }
  0xf7   : > { %938 = vpow2.f32 %v793_v43  ;;  %v798_v60 = vmul.f32 -1.442695, %v1161_v52  ;;  %v1173_v61 = vadd.f32 %v1115_v12, %v451_v53  ;;  %v1176_v62 = vadd.f32 %v1115_v12, %v446_v54 }
  0xf8   : > { %940 = vpow2.f32 %v801_v47  ;;  %v806_v63 = vmul.f32 -1.442695, %v1166_v57  ;;  %v796_v0 = vmul.f32 -1.442695, %v1169_v58  ;;  %v444_v17 = vmul.f32 %v1110_v10, %v388_v56 }
  0xf9   : > { %942 = vpow2.f32 %v798_v60  ;;  %v804_v1 = vmul.f32 -1.442695, %v1173_v61  ;;  %v799_v2 = vmul.f32 -1.442695, %v1176_v62  ;;  %v452_v21 = vmul.f32 %v1110_v10, %v420_v59 }
  0xfa   : > { %944 = vpow2.f32 %v806_v63  ;;  %v1186_v28 = vadd.f32 %v1115_v12, %v454_v14  ;;  %v1189_v33 = vadd.f32 %v1115_v12, %v444_v17 }
  0xfb   : > { %v927_v3 = vpop.eup %926  ;;  %946 = vpow2.f32 %v796_v0  ;;  %v1192_v10 = vadd.f32 %v1115_v12, %v452_v21 }
  0xfc   : > { %v929_v4 = vpop.eup %928  ;;  %v528_v5 = vadd.f32 1.0, %v927_v3  ;;  %948 = vpow2.f32 %v804_v1  ;;  %v807_v43 = vmul.f32 -1.442695, %v1186_v28  ;;  %v797_v46 = vmul.f32 -1.442695, %v1189_v33 }
  0xfd   : > { %v931_v6 = vpop.eup %930  ;;  %v536_v7 = vadd.f32 1.0, %v929_v4  ;;  %950 = vpow2.f32 %v799_v2  ;;  %v805_v12 = vmul.f32 -1.442695, %v1192_v10 }
  0xfe   : > { %v933_v8 = vpop.eup %932  ;;  %952 = vrcp.f32 %v528_v5  ;;  %v526_v9 = vadd.f32 1.0, %v931_v6 }
  0xff   : > { %v935_v11 = vpop.eup %934  ;;  %954 = vrcp.f32 %v536_v7  ;;  %v534_v13 = vadd.f32 1.0, %v933_v8 }
 0x100   : > { %v937_v15 = vpop.eup %936  ;;  %956 = vrcp.f32 %v526_v9  ;;  %v529_v16 = vadd.f32 1.0, %v935_v11 }
 0x101   : > { %v939_v18 = vpop.eup %938  ;;  %958 = vrcp.f32 %v534_v13  ;;  %v537_v19 = vadd.f32 1.0, %v937_v15 }
 0x102   : > { %v941_v22 = vpop.eup %940  ;;  %960 = vrcp.f32 %v529_v16  ;;  %v527_v23 = vadd.f32 1.0, %v939_v18 }
 0x103   : > { %v943_v24 = vpop.eup %942  ;;  %962 = vrcp.f32 %v537_v19  ;;  %v535_v27 = vadd.f32 1.0, %v941_v22 }
 0x104   : > { %v945_v29 = vpop.eup %944  ;;  %964 = vrcp.f32 %v527_v23  ;;  %v532_v30 = vadd.f32 1.0, %v943_v24 }
 0x105   : > { %v947_v34 = vpop.eup %946  ;;  %966 = vrcp.f32 %v535_v27  ;;  %v540_v35 = vadd.f32 1.0, %v945_v29 }
 0x106   : > { %v949_v38 = vpop.eup %948  ;;  %968 = vrcp.f32 %v532_v30  ;;  %v530_v39 = vadd.f32 1.0, %v947_v34 }
 0x107   : > { %v951_v41 = vpop.eup %950  ;;  %970 = vrcp.f32 %v540_v35  ;;  %v538_v42 = vadd.f32 1.0, %v949_v38 }
 0x108   : > { %v953_v44 = vpop.eup %952  ;;  %972 = vrcp.f32 %v530_v39  ;;  %v533_v45 = vadd.f32 1.0, %v951_v41 }
 0x109   : > { %v955_v47 = vpop.eup %954  ;;  %v576_v48 = vmul.f32 %v953_v44, %v1121_v20  ;;  %974 = vrcp.f32 %v538_v42 }
 0x10a   : > { %v957_v49 = vpop.eup %956  ;;  %v584_v50 = vmul.f32 %v955_v47, %v1126_v25  ;;  %976 = vrcp.f32 %v533_v45 }
 0x10b   : > { %v959_v51 = vpop.eup %958  ;;  %v828_v53 = vpack.c.bf16 %v576_v48, %v576_v48  ;;  %v574_v20 = vmul.f32 %v957_v49, %v1129_v26  ;;  %978 = vpow2.f32 %v807_v43 }
 0x10c   : > { %v961_v54 = vpop.eup %960  ;;  %v836_v55 = vpack.c.bf16 %v584_v50, %v584_v50  ;;  %v582_v56 = vmul.f32 %v959_v51, %v1135_v31  ;;  %980 = vpow2.f32 %v797_v46 }
 0x10d   : > { %v963_v59 = vpop.eup %962  ;;  %657 = vst.msk [vmem:[%s1203_s13 + $0x8] sm:$0xf] %vm654_vm1, %v828_v53  ;;  %v826_v60 = vpack.c.bf16 %v574_v20, %v574_v20  ;;  %v577_v25 = vmul.f32 %v961_v54, %v1138_v32  ;;  %982 = vpow2.f32 %v805_v12 }
 0x10e   : > { %v965_v63 = vpop.eup %964  ;;  %665 = vst.msk [vmem:[%s1203_s13 + $0x28] sm:$0xf] %vm654_vm1, %v836_v55  ;;  %v834_v26 = vpack.c.bf16 %v582_v56, %v582_v56  ;;  %v585_v0 = vmul.f32 %v963_v59, %v1144_v36 }
 0x10f   : > { %v967_v1 = vpop.eup %966  ;;  %655 = vst.msk [vmem:[%s1203_s13] sm:$0xf] %vm654_vm1, %v826_v60  ;;  %v829_v31 = vpack.c.bf16 %v577_v25, %v577_v25  ;;  %v575_v2 = vmul.f32 %v965_v63, %v1147_v37 }
 0x110   : > { %v969_v3 = vpop.eup %968  ;;  %663 = vst.msk [vmem:[%s1203_s13 + $0x20] sm:$0xf] %vm654_vm1, %v834_v26  ;;  %v837_v32 = vpack.c.bf16 %v585_v0, %v585_v0  ;;  %v583_v4 = vmul.f32 %v967_v1, %v1152_v40 }
 0x111   : > { %v971_v5 = vpop.eup %970  ;;  %658 = vst.msk [vmem:[%s1203_s13 + $0xc] sm:$0xf] %vm654_vm1, %v829_v31  ;;  %v827_v6 = vpack.c.bf16 %v575_v2, %v575_v2  ;;  %v580_v36 = vmul.f32 %v969_v3, %v1161_v52 }
 0x112   : > { %v973_v7 = vpop.eup %972  ;;  %666 = vst.msk [vmem:[%s1203_s13 + $0x2c] sm:$0xf] %vm654_vm1, %v837_v32  ;;  %v835_v8 = vpack.c.bf16 %v583_v4, %v583_v4  ;;  %v588_v37 = vmul.f32 %v971_v5, %v1166_v57 }
 0x113   : > { %v975_v9 = vpop.eup %974  ;;  %656 = vst.msk [vmem:[%s1203_s13 + $0x4] sm:$0xf] %vm654_vm1, %v827_v6  ;;  %v832_v11 = vpack.c.bf16 %v580_v36, %v580_v36  ;;  %v578_v40 = vmul.f32 %v973_v7, %v1169_v58 }
 0x114   : > { %v977_v13 = vpop.eup %976  ;;  %664 = vst.msk [vmem:[%s1203_s13 + $0x24] sm:$0xf] %vm654_vm1, %v835_v8  ;;  %v840_v14 = vpack.c.bf16 %v588_v37, %v588_v37  ;;  %v586_v52 = vmul.f32 %v975_v9, %v1173_v61 }
 0x115   : > { %v979_v15 = vpop.eup %978  ;;  %661 = vst.msk [vmem:[%s1203_s13 + $0x18] sm:$0xf] %vm654_vm1, %v832_v11  ;;  %v830_v16 = vpack.c.bf16 %v578_v40, %v578_v40  ;;  %v581_v57 = vmul.f32 %v977_v13, %v1176_v62 }
 0x116   : > { %v981_v17 = vpop.eup %980  ;;  %669 = vst.msk [vmem:[%s1203_s13 + $0x38] sm:$0xf] %vm654_vm1, %v840_v14  ;;  %v838_v18 = vpack.c.bf16 %v586_v52, %v586_v52  ;;  %v541_v19 = vadd.f32 1.0, %v979_v15 }
 0x117   : > { %v983_v58 = vpop.eup %982  ;;  %659 = vst.msk [vmem:[%s1203_s13 + $0x10] sm:$0xf] %vm654_vm1, %v830_v16  ;;  %v833_v21 = vpack.c.bf16 %v581_v57, %v581_v57  ;;  %v531_v22 = vadd.f32 1.0, %v981_v17 }
 0x118   : > { %667 = vst.msk [vmem:[%s1203_s13 + $0x30] sm:$0xf] %vm654_vm1, %v838_v18  ;;  %984 = vrcp.f32 %v541_v19  ;;  %v539_v61 = vadd.f32 1.0, %v983_v58 }
 0x119   : > { %662 = vst.msk [vmem:[%s1203_s13 + $0x1c] sm:$0xf] %vm654_vm1, %v833_v21  ;;  %986 = vrcp.f32 %v531_v22 }
 0x11a   : > { %988 = vrcp.f32 %v539_v61 }
 0x122   : > { %v985_v62 = vpop.eup %984 }
 0x123   : > { %v987_v23 = vpop.eup %986  ;;  %v589_v24 = vmul.f32 %v985_v62, %v1186_v28 }
 0x124   : > { %v989_v27 = vpop.eup %988  ;;  %v579_v29 = vmul.f32 %v987_v23, %v1189_v33 }
 0x125   : > { %v841_v30 = vpack.c.bf16 %v589_v24, %v589_v24  ;;  %v587_v34 = vmul.f32 %v989_v27, %v1192_v10 }
 0x126   : > { %v831_v35 = vpack.c.bf16 %v579_v29, %v579_v29 }
 0x127   : > { %670 = vst.msk [vmem:[%s1203_s13 + $0x3c] sm:$0xf] %vm654_vm1, %v841_v30  ;;  %v839_v38 = vpack.c.bf16 %v587_v34, %v587_v34 }
 0x128   : > { %660 = vst.msk [vmem:[%s1203_s13 + $0x14] sm:$0xf] %vm654_vm1, %v831_v35 }
 0x129   : > { %668 = vst.msk [vmem:[%s1203_s13 + $0x34] sm:$0xf] %vm654_vm1, %v839_v38 }
 0x12a PF: > { %s14_s19 = sadd.s32 1, %s1028_s19   ;;  %s1272_s15 = smov %s1020_s17 }
 0x12b   : > { %p11_p7 = scmp.ge.s32.totalorder %s14_s19, 18   ;;  %s1273_s16 = smov %s1024_s18 }
 0x12c   : > { %s1274_s17 = smov %s1277_s20  ;;  %s1275_s18 = smov %s1281_s21 }
 0x12d   :  { %13 = sbr.rel (!%p11_p7) target bundleno = 3 (0x3), region = 66 }

</bundles_post_ra>
